<compile_context>
chip_gen: v7x
topology: tpu7x:2x2x1
jax: 0.10.0
libtpu: 0.0.40
codegen_flags: <defaults>
</compile_context>

<pallas_src>
import functools
import math

import jax
import jax.numpy as jnp
from jax.experimental import pallas as pl
from jax.experimental.pallas import tpu as pltpu

LANE = 128
ROW_TILE = 16  # bf16 sublane packing is (16, 128): keep batch tiles 16-row aligned


def _round_up(n, m):
    return ((n + m - 1) // m) * m


def _cdiv(a, b):
    return -(-a // b)


def _vmem_capacity_bytes():
    try:
        return int(pltpu.get_tpu_info().vmem_capacity_bytes)
    except Exception:
        return 64 * 1024 * 1024  # conservative fallback: v7x physical VMEM per TC


# ----------------------------------------------------------------------------
# Kernel
# ----------------------------------------------------------------------------
def make_mlp_kernel(num_layers: int, activation: str):
    """Ref order: x, (w0, b0), ..., (w_{L-1}, b_{L-1}), out.

    After the prepare_params() fold, the chain is `num_layers` Linears with the
    activation applied after every layer except the last (the classifier).
    Weights are bf16 (in_pad, out_pad), biases f32 (1, out_pad),
    x tile f32 (tb, in_dim), out tile bf16 (tb, out_pad).
    """

    def _act(h32):
        if activation == "relu":
            return jnp.maximum(h32, 0.0)
        if activation == "elu":
            # NB: expm1 is also evaluated on the positive branch, which may
            # overflow there; this is safe because jnp.where is a hardware
            # select (not an arithmetic blend), so discarded lanes never reach
            # the result.  Do NOT "optimize" this into a masked multiply.
            return jnp.where(h32 > 0.0, h32, jnp.expm1(h32))
        return h32  # PyTorch module appends no activation for other strings

    def kernel(*refs):
        x_ref, out_ref = refs[0], refs[-1]
        # Cast to bf16 on the VPU (x stays unpadded f32 in HBM).  The MXU is
        # natively bf16 and accumulates in f32 via preferred_element_type.
        h_lo = x_ref[...].astype(jnp.bfloat16)
        h32 = None
        idx = 1
        for layer in range(num_layers):
            w_ref, b_ref = refs[idx], refs[idx + 1]
            idx += 2
            h32 = (
                jnp.dot(h_lo, w_ref[...], preferred_element_type=jnp.float32)
                + b_ref[...]
            )
            if layer < num_layers - 1:
                h_lo = _act(h32).astype(jnp.bfloat16)
        out_ref[...] = h32.astype(out_ref.dtype)

    return kernel


# ----------------------------------------------------------------------------
# One-time parameter preprocessing (fold + pad + cast), outside the hot path
# ----------------------------------------------------------------------------
def prepare_params(params):
    """params: [(W, b)] with W (fan_in, fan_out), b (fan_out,), in module order:
    self.inputs, self.layers' Linears, self.classifer.

    There is never an activation between self.inputs and the next Linear, so
    that pair is folded into one Linear in f32 (W0@W1, b0@W1+b1).  Output dims
    are zero-padded to 128 lanes; input dims of every layer after the first are
    padded likewise.  Zero padding is exact: padded weight columns/bias entries
    are 0, and ReLU(0)=ELU(0)=0, so padded activations stay 0 down the chain.
    Weights are cast to bf16 for the MXU; biases stay f32.
    """
    params = [(jnp.asarray(w, jnp.float32), jnp.asarray(b, jnp.float32))
              for w, b in params]
    num_hidden = len(params) - 1
    if num_hidden == 0:
        chain = list(params)
    else:
        (w0, b0), (w1, b1) = params[0], params[1]
        chain = [(w0 @ w1, b0 @ w1 + b1)] + list(params[2:])

    prepped = []
    for li, (w, b) in enumerate(chain):
        fi, fo = w.shape
        fi_p = fi if li == 0 else _round_up(fi, LANE)  # first K matches raw x
        fo_p = _round_up(fo, LANE)
        w_p = (
            jnp.zeros((fi_p, fo_p), jnp.float32)
            .at[:fi, :fo].set(w)
            .astype(jnp.bfloat16)
        )
        b_p = jnp.zeros((1, fo_p), jnp.float32).at[0, :fo].set(b)
        prepped.append((w_p, b_p))
    return prepped


# ----------------------------------------------------------------------------
# Forward wrapper
# ----------------------------------------------------------------------------
@functools.partial(
    jax.jit,
    static_argnames=("activation", "num_classes", "block_batch", "force_even_grid"),
)
def mlp_forward(x, prepped_params, *, activation="relu", num_classes=1,
                block_batch=None, force_even_grid=False):
    """x: (batch, input_dim) f32; prepped_params from prepare_params()."""
    num_layers = len(prepped_params)
    batch, in_dim = x.shape
    assert prepped_params[0][0].shape[0] == in_dim, "param / input dim mismatch"
    out_pad = prepped_params[-1][0].shape[1]

    # --- batch tiling --------------------------------------------------------
    batch16 = _round_up(batch, ROW_TILE)
    cap = 1024
    if block_batch is not None:
        tb = min(_round_up(max(block_batch, ROW_TILE), ROW_TILE), batch16, cap)
    else:
        tb = min(batch16, cap)
    grid_n = _cdiv(batch16, tb)
    if force_even_grid and batch16 >= 2 * ROW_TILE and grid_n % 2 == 1:
        # v7x: give both TensorCores work via an even tile count.
        grid_n += 1
        tb = _round_up(_cdiv(batch16, grid_n), ROW_TILE)
        grid_n = _cdiv(batch16, tb)
    batch_pad = grid_n * tb
    # If batch_pad > batch, the last x block reads past the array: Pallas pads
    # the DMA and the garbage rows only affect their own (sliced-off) output rows.

    kernel = make_mlp_kernel(num_layers, activation)

    flat_args = [x]
    in_specs = [pl.BlockSpec((tb, in_dim), lambda i: (i, 0))]
    param_bytes = 0
    flops = 0
    act_elems = 0
    for li, (w, b) in enumerate(prepped_params):
        flat_args += [w, b]
        # Weights / biases stay VMEM-resident across batch tiles (constant index_map).
        in_specs.append(pl.BlockSpec(w.shape, lambda i: (0, 0)))
        in_specs.append(pl.BlockSpec(b.shape, lambda i: (0, 0)))
        param_bytes += w.size * w.dtype.itemsize + b.size * b.dtype.itemsize
        flops += 2 * batch_pad * w.shape[0] * w.shape[1]
        if li < num_layers - 1:
            act_elems += batch_pad * w.shape[1]

    transcendentals = act_elems if activation == "elu" else 0
    bytes_accessed = (x.size * x.dtype.itemsize
                      + batch_pad * out_pad * 2
                      + param_bytes)

    # --- VMEM budget (generation-aware) --------------------------------------
    widest = max(w.shape[1] for w, _ in prepped_params)
    tile_bytes = tb * in_dim * 4 + tb * out_pad * 2       # one x tile + one out tile
    vmem_need = 2 * (param_bytes + tile_bytes) + 3 * tb * widest * 4  # 2x: double-buffer
    phys = _vmem_capacity_bytes()
    vmem_limit = int(min(max(2 * vmem_need, 32 * 1024 * 1024),
                         phys - 16 * 1024 * 1024))

    out_padded = pl.pallas_call(
        kernel,
        out_shape=jax.ShapeDtypeStruct((batch_pad, out_pad), jnp.bfloat16),
        grid=(grid_n,),
        in_specs=in_specs,
        out_specs=pl.BlockSpec((tb, out_pad), lambda i: (i, 0)),
        compiler_params=pltpu.CompilerParams(
            dimension_semantics=("parallel",),  # shard batch tiles across TCs (v7x)
            vmem_limit_bytes=vmem_limit,
        ),
        cost_estimate=pl.CostEstimate(
            flops=flops,
            transcendentals=transcendentals,
            bytes_accessed=bytes_accessed,
        ),
    )(*flat_args)

    return out_padded[:batch, :num_classes].astype(jnp.float32)


# ----------------------------------------------------------------------------
# Init + pure-JAX reference (mirrors the PyTorch module layer-by-layer, f32)
# ----------------------------------------------------------------------------
def init_linear(key, fan_in, fan_out):
    """PyTorch nn.Linear default init: U(-1/sqrt(fan_in), 1/sqrt(fan_in))."""
    kw, kb = jax.random.split(key)
    bound = 1.0 / math.sqrt(fan_in)
    w = jax.random.uniform(kw, (fan_in, fan_out), jnp.float32, -bound, bound)
    b = jax.random.uniform(kb, (fan_out,), jnp.float32, -bound, bound)
    return w, b


def reference_forward(x, params, activation="relu"):
    def act(h):
        if activation == "relu":
            return jnp.maximum(h, 0.0)
        if activation == "elu":
            return jnp.where(h > 0.0, h, jnp.expm1(h))
        return h

    num_hidden = len(params) - 1
    h = x.astype(jnp.float32)
    if num_hidden > 0:
        w, b = params[0]
        h = h @ w + b                      # self.inputs (no activation)
        for i in range(1, num_hidden):
            w, b = params[i]
            h = act(h @ w + b)             # self.layers
    w, b = params[-1]
    return h @ w + b                       # self.classifer (no activation)


# ----------------------------------------------------------------------------
if __name__ == "__main__":
    # Small config consistent with the module: input_dim=29, two hidden layers
    # (so the activation inside self.layers is exercised), num_classes=1.
    input_dim = 29
    hidden_sizes = (32, 16)
    num_classes = 1
    batch = 256

    root = jax.random.PRNGKey(0)
    keys = jax.random.split(root, len(hidden_sizes) + 2)

    dims = [input_dim] + list(hidden_sizes)
    params = [init_linear(keys[i], dims[i], dims[i + 1])
              for i in range(len(hidden_sizes))]
    params.append(init_linear(keys[len(hidden_sizes)], hidden_sizes[-1], num_classes))

    prepped = prepare_params(params)
    x = jax.random.normal(keys[-1], (batch, input_dim), jnp.float32)

    ok = True
    for act in ("relu", "elu"):
        ref = reference_forward(x, params, activation=act)
        # Default tiling: whole batch in a single tile (grid=(1,)).
        out1 = jax.block_until_ready(
            mlp_forward(x, prepped, activation=act, num_classes=num_classes))
        # Multi-tile path (grid=(4,)) to exercise the pipelined batch loop.
        out4 = jax.block_until_ready(
            mlp_forward(x, prepped, activation=act, num_classes=num_classes,
                        block_batch=64))
        for out in (out1, out4):
            assert out.shape == (batch, num_classes), out.shape
            ok &= bool(jnp.allclose(out, ref, atol=3e-2, rtol=3e-2))

    assert ok, "kernel output mismatch vs reference"
    print("KERNEL_OK")
</pallas_src>

<mosaic_0001>
module attributes {stable_mosaic.version = 11 : i64} {
  func.func @kernel(%arg0: i32, %arg1: memref<256x29xf32, #tpu.memory_space<vmem>>, %arg2: memref<29x128xbf16, #tpu.memory_space<vmem>>, %arg3: memref<1x128xf32, #tpu.memory_space<vmem>>, %arg4: memref<128x128xbf16, #tpu.memory_space<vmem>>, %arg5: memref<1x128xf32, #tpu.memory_space<vmem>>, %arg6: memref<256x128xbf16, #tpu.memory_space<vmem>>) attributes {dimension_semantics = [#tpu.dimension_semantics<parallel>], iteration_bounds = array<i64: 1>, scalar_prefetch = 0 : i64, scratch_operands = 0 : i64, tpu.core_type = #tpu.core_type<tc>, window_params = [{transform_indices = @transform_0, window_bounds = array<i64: 256, 29>}, {pipeline_mode = #tpu.pipeline_mode<synchronous>, transform_indices = @transform_1, window_bounds = array<i64: 29, 128>}, {pipeline_mode = #tpu.pipeline_mode<synchronous>, transform_indices = @transform_2, window_bounds = array<i64: 1, 128>}, {pipeline_mode = #tpu.pipeline_mode<synchronous>, transform_indices = @transform_3, window_bounds = array<i64: 128, 128>}, {pipeline_mode = #tpu.pipeline_mode<synchronous>, transform_indices = @transform_4, window_bounds = array<i64: 1, 128>}, {transform_indices = @transform_5, window_bounds = array<i64: 256, 128>}]} {
    %c0 = arith.constant 0 : index
    %c0_0 = arith.constant 0 : index
    %0 = vector.load %arg1[%c0, %c0_0] : memref<256x29xf32, #tpu.memory_space<vmem>>, vector<256x29xf32>
    %1 = arith.truncf %0 : vector<256x29xf32> to vector<256x29xbf16>
    %c0_1 = arith.constant 0 : index
    %c0_2 = arith.constant 0 : index
    %2 = vector.load %arg2[%c0_1, %c0_2] : memref<29x128xbf16, #tpu.memory_space<vmem>>, vector<29x128xbf16>
    %cst = arith.constant dense<0.000000e+00> : vector<256x128xf32>
    %3 = tpu.matmul %1, %2, %cst {dimension_numbers = #tpu.dot_dimension_numbers<[1], [0], [0], [1], [0, 0, 1, 1], [], []>} : vector<256x29xbf16>, vector<29x128xbf16>, vector<256x128xf32> -> vector<256x128xf32>
    %c0_3 = arith.constant 0 : index
    %c0_4 = arith.constant 0 : index
    %4 = vector.load %arg3[%c0_3, %c0_4] : memref<1x128xf32, #tpu.memory_space<vmem>>, vector<1x128xf32>
    %5 = vector.broadcast %4 : vector<1x128xf32> to vector<256x128xf32>
    %6 = arith.addf %3, %5 : vector<256x128xf32>
    %cst_5 = arith.constant 0.000000e+00 : f32
    %7 = vector.broadcast %cst_5 : f32 to vector<256x128xf32>
    %8 = arith.maximumf %6, %7 : vector<256x128xf32>
    %9 = arith.truncf %8 : vector<256x128xf32> to vector<256x128xbf16>
    %c0_6 = arith.constant 0 : index
    %c0_7 = arith.constant 0 : index
    %10 = vector.load %arg4[%c0_6, %c0_7] : memref<128x128xbf16, #tpu.memory_space<vmem>>, vector<128x128xbf16>
    %cst_8 = arith.constant dense<0.000000e+00> : vector<256x128xf32>
    %11 = tpu.matmul %9, %10, %cst_8 {dimension_numbers = #tpu.dot_dimension_numbers<[1], [0], [0], [1], [0, 0, 1, 1], [], []>} : vector<256x128xbf16>, vector<128x128xbf16>, vector<256x128xf32> -> vector<256x128xf32>
    %c0_9 = arith.constant 0 : index
    %c0_10 = arith.constant 0 : index
    %12 = vector.load %arg5[%c0_9, %c0_10] : memref<1x128xf32, #tpu.memory_space<vmem>>, vector<1x128xf32>
    %13 = vector.broadcast %12 : vector<1x128xf32> to vector<256x128xf32>
    %14 = arith.addf %11, %13 : vector<256x128xf32>
    %15 = arith.truncf %14 : vector<256x128xf32> to vector<256x128xbf16>
    %c0_11 = arith.constant 0 : index
    %c0_12 = arith.constant 0 : index
    %16 = vector.load %arg6[%c0_11, %c0_12] : memref<256x128xbf16, #tpu.memory_space<vmem>>, vector<256x128xbf16>
    tpu.vector_store %arg6[%c0_11, %c0_12], %15 {strides = array<i32>} : memref<256x128xbf16, #tpu.memory_space<vmem>>, vector<256x128xbf16>,
    return
  }
  func.func @transform_0(%arg0: i32) -> (i32, i32) {
    %c0_i32 = arith.constant 0 : i32
    %c0_i32_0 = arith.constant 0 : i32
    return %arg0, %c0_i32 : i32, i32
  }
  func.func @transform_1(%arg0: i32) -> (i32, i32) {
    %c0_i32 = arith.constant 0 : i32
    %c0_i32_0 = arith.constant 0 : i32
    %c0_i32_1 = arith.constant 0 : i32
    return %c0_i32, %c0_i32_0 : i32, i32
  }
  func.func @transform_2(%arg0: i32) -> (i32, i32) {
    %c0_i32 = arith.constant 0 : i32
    %c0_i32_0 = arith.constant 0 : i32
    %c0_i32_1 = arith.constant 0 : i32
    return %c0_i32, %c0_i32_0 : i32, i32
  }
  func.func @transform_3(%arg0: i32) -> (i32, i32) {
    %c0_i32 = arith.constant 0 : i32
    %c0_i32_0 = arith.constant 0 : i32
    %c0_i32_1 = arith.constant 0 : i32
    return %c0_i32, %c0_i32_0 : i32, i32
  }
  func.func @transform_4(%arg0: i32) -> (i32, i32) {
    %c0_i32 = arith.constant 0 : i32
    %c0_i32_0 = arith.constant 0 : i32
    %c0_i32_1 = arith.constant 0 : i32
    return %c0_i32, %c0_i32_0 : i32, i32
  }
  func.func @transform_5(%arg0: i32) -> (i32, i32) {
    %c0_i32 = arith.constant 0 : i32
    %c0_i32_0 = arith.constant 0 : i32
    return %arg0, %c0_i32 : i32, i32
  }
}

</mosaic_0001>

<bundles_post_ra>
// kernel: mlp_forward.1
= control target key start
LH: loop header
LB: loop body
LE: loop exit
PB: predicated region body
PF: predicated region fallthrough
CT: control target
= control target key end

     0   :  { %vm140_vm0 = vcmask 1045504   ;;  %vm141_vm1 = vcmask 1046528   ;;  %v1092_v1 = vmov 65535   ;;  %vm91_vm2 = vcmask 236544   ;;  %s1387_s1 = inlined_call_operand.vmem [shape: bf16[29,128], index: 1, kind: input, shape index: {}]   ;;  %s1388_s0 = inlined_call_operand.vmem [shape: f32[256,29], index: 0, kind: input, shape index: {}]   ;;  %s1389_s3 = inlined_call_operand.vmem [shape: bf16[128,128], index: 3, kind: input, shape index: {}]   ;;  %s1390_s2 = inlined_call_operand.vmem [shape: f32[1,128], index: 2, kind: input, shape index: {}]   ;;  %s1391_s4 = inlined_call_operand.vmem [shape: f32[1,128], index: 4, kind: input, shape index: {}]   ;;  %s1392_s5 = inlined_call_operand.vmem [shape: bf16[256,128], index: 5, kind: output, shape index: {}]  }
   0x1   :  { %v1082_v0 = vld [vmem:[%s1387_s1] sm:$0xff]   ;;  %v142_v2 = vsel %vm140_vm0, 4294967295, %v1092_v1  ;;  %v1083_v3 = vld [vmem:[%s1387_s1 + $0x8] sm:$0x7f]   ;;  %v23_v9 = vld [vmem:[%s1388_s0 + $0x10] sm:$0xff] }
   0x2   :  { %981 = vmatprep.subr.bf16.mxu0 %v1082_v0  ;;  %v143_v4 = vsel %vm141_vm1, %v142_v2, 0  ;;  %v21_v5 = vld [vmem:[%s1388_s0] sm:$0xff]  ;;  %v22_v6 = vld [vmem:[%s1388_s0 + $0x8] sm:$0xff]  ;;  %v24_v10 = vld [vmem:[%s1388_s0 + $0x18] sm:$0xff] }
   0x3   :  { %982 = vmatpush3.bf16.msra.mxu0 %v1082_v0  ;;  %v145_v7 = vand.u32 %v1083_v3, %v143_v4  ;;  %v53_v8 = vpack.c.bf16 %v22_v6, %v21_v5  ;;  %v25_v11 = vld [vmem:[%s1388_s0 + $0x20] sm:$0xff]  ;;  %v26_v12 = vld [vmem:[%s1388_s0 + $0x28] sm:$0xff]  ;;  %v54_v13 = vpack.c.bf16 %v24_v10, %v23_v9  ;;  %v27_v15 = vld [vmem:[%s1388_s0 + $0x30] sm:$0xff] }
   0x4   :  { %v55_v14 = vpack.c.bf16 %v26_v12, %v25_v11  ;;  %v28_v16 = vld [vmem:[%s1388_s0 + $0x38] sm:$0xff]  ;;  %v29_v17 = vld [vmem:[%s1388_s0 + $0x40] sm:$0xff]  ;;  %v30_v18 = vld [vmem:[%s1388_s0 + $0x48] sm:$0xff] }
   0x5   :  { %983 = vmatprep.subr.bf16.mxu0 %v145_v7  ;;  %985 = vmatprep.mubr.msk.bf16.mxu0 %vm91_vm2, %v53_v8  ;;  %v1084_v19 = vld [vmem:[%s1389_s3] sm:$0xff]   ;;  %v56_v20 = vpack.c.bf16 %v28_v16, %v27_v15  ;;  %v1085_v21 = vld [vmem:[%s1389_s3 + $0x8] sm:$0xff]   ;;  %v57_v22 = vpack.c.bf16 %v30_v18, %v29_v17  ;;  %v31_v23 = vld [vmem:[%s1388_s0 + $0x50] sm:$0xff] }
   0x6   :  { %1065 = vmatprep.subr.bf16.mxu1 %v1084_v19  ;;  %v1086_v24 = vld [vmem:[%s1389_s3 + $0x10] sm:$0xff]   ;;  %v32_v25 = vld [vmem:[%s1388_s0 + $0x58] sm:$0xff]  ;;  %v33_v26 = vld [vmem:[%s1388_s0 + $0x60] sm:$0xff] }
   0x7   :  { %984 = vmatpush3.bf16.msra.mxu0 %v145_v7  ;;  %1073 = vmatpush3.bf16.msra.mxu1 %v1084_v19  ;;  %v34_v27 = vld [vmem:[%s1388_s0 + $0x68] sm:$0xff]  ;;  %v1087_v28 = vld [vmem:[%s1389_s3 + $0x18] sm:$0xff]   ;;  %v58_v29 = vpack.c.bf16 %v32_v25, %v31_v23  ;;  %v1088_v31 = vld [vmem:[%s1389_s3 + $0x20] sm:$0xff]  }
   0x8   :  { %1017 = vmatprep.subr.bf16.mxu0 %v1084_v19  ;;  %1066 = vmatprep.subr.bf16.mxu1 %v1085_v21  ;;  %v59_v30 = vpack.c.bf16 %v34_v27, %v33_v26  ;;  %v35_v32 = vld [vmem:[%s1388_s0 + $0x70] sm:$0xff]  ;;  %v36_v33 = vld [vmem:[%s1388_s0 + $0x78] sm:$0xff]  ;;  %v37_v34 = vld [vmem:[%s1388_s0 + $0x80] sm:$0xff] }
   0x9   :  { %v38_v35 = vld [vmem:[%s1388_s0 + $0x88] sm:$0xff]  ;;  %v60_v37 = vpack.c.bf16 %v36_v33, %v35_v32  ;;  %v39_v39 = vld [vmem:[%s1388_s0 + $0x90] sm:$0xff]  ;;  %v40_v40 = vld [vmem:[%s1388_s0 + $0x98] sm:$0xff] }
   0xa   :  { %986 = vmatmul.mubr.msk.bf16.vlgmr.msra.gmra.mrb[0].mxu0 %vm91_vm2, %v54_v13  ;;  %v1089_v36 = vld [vmem:[%s1389_s3 + $0x28] sm:$0xff]   ;;  %v61_v38 = vpack.c.bf16 %v38_v35, %v37_v34  ;;  %v41_v41 = vld [vmem:[%s1388_s0 + $0xa0] sm:$0xff]  ;;  %v62_v43 = vpack.c.bf16 %v40_v40, %v39_v39  ;;  %v43_v45 = vld [vmem:[%s1388_s0 + $0xb0] sm:$0xff] }
   0xb   :  { %989 = vmatprep.mubr.msk.bf16.mxu0 %vm91_vm2, %v55_v14  ;;  %1018 = vmatpush3.bf16.msra.mxu0 %v1084_v19  ;;  %v42_v42 = vld [vmem:[%s1388_s0 + $0xa8] sm:$0xff]  ;;  %v44_v46 = vld [vmem:[%s1388_s0 + $0xb8] sm:$0xff]  ;;  %v45_v47 = vld [vmem:[%s1388_s0 + $0xc0] sm:$0xff] }
   0xc   :  { %1019 = vmatprep.subr.bf16.mxu0 %v1085_v21  ;;  %1074 = vmatpush3.bf16.msra.mxu1 %v1085_v21  ;;  %v63_v44 = vpack.c.bf16 %v42_v42, %v41_v41  ;;  %v46_v48 = vld [vmem:[%s1388_s0 + $0xc8] sm:$0xff]  ;;  %v64_v49 = vpack.c.bf16 %v44_v46, %v43_v45  ;;  %v47_v51 = vld [vmem:[%s1388_s0 + $0xd0] sm:$0xff]  ;;  %v48_v52 = vld [vmem:[%s1388_s0 + $0xd8] sm:$0xff] }
   0xd   :  { %1067 = vmatprep.subr.bf16.mxu1 %v1086_v24  ;;  %v65_v50 = vpack.c.bf16 %v46_v48, %v45_v47  ;;  %v49_v53 = vld [vmem:[%s1388_s0 + $0xe0] sm:$0xff]  ;;  %v50_v54 = vld [vmem:[%s1388_s0 + $0xe8] sm:$0xff]  ;;  %v66_v55 = vpack.c.bf16 %v48_v52, %v47_v51  ;;  %v51_v57 = vld [vmem:[%s1388_s0 + $0xf0] sm:$0xff] }
   0xe   :  { %v67_v56 = vpack.c.bf16 %v50_v54, %v49_v53  ;;  %v52_v58 = vld [vmem:[%s1388_s0 + $0xf8] sm:$0xff]  ;;  %v1090_v60 = vld [vmem:[%s1389_s3 + $0x30] sm:$0xff]   ;;  %v1268_v62 = vld [vmem:[%s1390_s2] ss:$0 sm:$0xff] }
   0xf   :  { %1020 = vmatpush3.bf16.msra.mxu0 %v1085_v21  ;;  %v68_v59 = vpack.c.bf16 %v52_v58, %v51_v57  ;;  %v1091_v61 = vld [vmem:[%s1389_s3 + $0x38] sm:$0xff]  }
  0x10   :  { %1021 = vmatprep.subr.bf16.mxu0 %v1086_v24  ;;  %1075 = vmatpush3.bf16.msra.mxu1 %v1086_v24 }
  0x11   :  { %1068 = vmatprep.subr.bf16.mxu1 %v1087_v28 }
  0x12   :  { %990 = vmatmul.mubr.msk.bf16.gmra.mrb[4].mxu0 %vm91_vm2, %v56_v20 }
  0x13   :  { %993 = vmatprep.mubr.msk.bf16.mxu0 %vm91_vm2, %v57_v22  ;;  %1022 = vmatpush3.bf16.msra.mxu0 %v1086_v24 }
  0x14   :  { %1023 = vmatprep.subr.bf16.mxu0 %v1087_v28  ;;  %1076 = vmatpush3.bf16.msra.mxu1 %v1087_v28 }
  0x15   :  { %1069 = vmatprep.subr.bf16.mxu1 %v1088_v31 }
  0x17   :  { %1024 = vmatpush3.bf16.msra.mxu0 %v1087_v28 }
  0x18   :  { %1025 = vmatprep.subr.bf16.mxu0 %v1088_v31  ;;  %1077 = vmatpush3.bf16.msra.mxu1 %v1088_v31 }
  0x19   :  { %1070 = vmatprep.subr.bf16.mxu1 %v1089_v36 }
  0x1a   :  { %994 = vmatmul.mubr.msk.bf16.gmra.mrb[8].mxu0 %vm91_vm2, %v58_v29 }
  0x1b   :  { %997 = vmatprep.mubr.msk.bf16.mxu0 %vm91_vm2, %v59_v30  ;;  %1026 = vmatpush3.bf16.msra.mxu0 %v1088_v31 }
  0x1c   :  { %1027 = vmatprep.subr.bf16.mxu0 %v1089_v36  ;;  %1078 = vmatpush3.bf16.msra.mxu1 %v1089_v36 }
  0x1d   :  { %1071 = vmatprep.subr.bf16.mxu1 %v1090_v60 }
  0x1f   :  { %1028 = vmatpush3.bf16.msra.mxu0 %v1089_v36 }
  0x20   :  { %1029 = vmatprep.subr.bf16.mxu0 %v1090_v60  ;;  %1079 = vmatpush3.bf16.msra.mxu1 %v1090_v60 }
  0x21   :  { %1072 = vmatprep.subr.bf16.mxu1 %v1091_v61 }
  0x22   :  { %998 = vmatmul.mubr.msk.bf16.gmra.mrb[12].mxu0 %vm91_vm2, %v60_v37 }
  0x23   :  { %1001 = vmatprep.mubr.msk.bf16.mxu0 %vm91_vm2, %v61_v38  ;;  %1030 = vmatpush3.bf16.msra.mxu0 %v1090_v60 }
  0x24   :  { %1031 = vmatprep.subr.bf16.mxu0 %v1091_v61  ;;  %1080 = vmatpush3.bf16.msra.mxu1 %v1091_v61 }
  0x27   :  { %1032 = vmatpush3.bf16.msra.mxu0 %v1091_v61 }
  0x2a   :  { %1002 = vmatmul.mubr.msk.bf16.gmra.mrb[16].mxu0 %vm91_vm2, %v62_v43 }
  0x2b   :  { %1005 = vmatprep.mubr.msk.bf16.mxu0 %vm91_vm2, %v63_v44 }
  0x32   :  { %1006 = vmatmul.mubr.msk.bf16.gmra.mrb[20].mxu0 %vm91_vm2, %v64_v49 }
  0x33   :  { %1009 = vmatprep.mubr.msk.bf16.mxu0 %vm91_vm2, %v65_v50 }
  0x3a   :  { %1010 = vmatmul.mubr.msk.bf16.gmra.mrb[24].mxu0 %vm91_vm2, %v66_v55 }
  0x3b   :  { %1013 = vmatprep.mubr.msk.bf16.mxu0 %vm91_vm2, %v67_v56 }
  0x42   :  { %1014 = vmatmul.mubr.msk.bf16.gmra.mrb[28].mxu0 %vm91_vm2, %v68_v59 }
  0xdd   :  { %v987_v63 = vpop.f32.mrb[0].mxu0 }
  0xde   :  { %v190_v0 = vadd.f32 %v987_v63, %v1268_v62  ;;  %v181_v1 = vpop.f32.mrb[1].mxu0 }
  0xdf   :  { %v182_v2 = vadd.f32 %v1268_v62, %v181_v1  ;;  %v988_v3 = vpop.f32.mrb[2].mxu0 }
  0xe0   :  { %v193_v4 = vadd.f32 %v988_v3, %v1268_v62  ;;  %v184_v5 = vpop.f32.mrb[3].mxu0  ;;  %v310_v7 = vmax.f32 %v190_v0, 0.0 }
  0xe1   :  { %v185_v6 = vadd.f32 %v1268_v62, %v184_v5  ;;  %v308_v9 = vmax.f32 %v182_v2, 0.0 }
  0xe2   :  { %v311_v8 = vmax.f32 %v193_v4, 0.0 }
  0xe3   :  { %v309_v10 = vmax.f32 %v185_v6, 0.0 }
  0xe4   :  { %v341_v11 = vpack.c.bf16 %v311_v8, %v310_v7 }
  0xe5   :  { %v340_v12 = vpack.c.bf16 %v309_v10, %v308_v9  ;;  %v991_v13 = vpop.f32.mrb[4].mxu0 }
  0xe6   :  { %v206_v14 = vadd.f32 %v991_v13, %v1268_v62  ;;  %v197_v15 = vpop.f32.mrb[5].mxu0 }
  0xe7   :  { %v198_v16 = vadd.f32 %v1268_v62, %v197_v15  ;;  %v992_v17 = vpop.f32.mrb[6].mxu0  ;;  %1033 = vmatprep.mubr.bf16.mxu0 %v340_v12 }
  0xe8   :  { %v209_v18 = vadd.f32 %v992_v17, %v1268_v62  ;;  %v200_v19 = vpop.f32.mrb[7].mxu0  ;;  %1034 = vmatmul.mubr.bf16.vlgmr.msra.gmra.mrb[32].mxu0 %v341_v11  ;;  %v314_v21 = vmax.f32 %v206_v14, 0.0 }
  0xe9   :  { %v201_v20 = vadd.f32 %v1268_v62, %v200_v19  ;;  %v312_v23 = vmax.f32 %v198_v16, 0.0 }
  0xea   :  { %v315_v22 = vmax.f32 %v209_v18, 0.0 }
  0xeb   :  { %v313_v24 = vmax.f32 %v201_v20, 0.0 }
  0xec   :  { %v343_v25 = vpack.c.bf16 %v315_v22, %v314_v21 }
  0xed   :  { %v995_v26 = vpop.f32.mrb[8].mxu0  ;;  %v342_v27 = vpack.c.bf16 %v313_v24, %v312_v23 }
  0xee   :  { %v222_v28 = vadd.f32 %v995_v26, %v1268_v62  ;;  %v213_v29 = vpop.f32.mrb[9].mxu0 }
  0xef   :  { %v214_v30 = vadd.f32 %v1268_v62, %v213_v29  ;;  %v996_v31 = vpop.f32.mrb[10].mxu0  ;;  %1037 = vmatprep.mubr.bf16.mxu1 %v342_v27 }
  0xf0   :  { %v225_v32 = vadd.f32 %v996_v31, %v1268_v62  ;;  %v216_v33 = vpop.f32.mrb[11].mxu0  ;;  %1038 = vmatmul.mubr.bf16.vlgmr.msra.gmra.mrb[0].mxu1 %v343_v25  ;;  %v318_v35 = vmax.f32 %v222_v28, 0.0 }
  0xf1   :  { %v217_v34 = vadd.f32 %v1268_v62, %v216_v33  ;;  %v316_v37 = vmax.f32 %v214_v30, 0.0 }
  0xf2   :  { %v319_v36 = vmax.f32 %v225_v32, 0.0 }
  0xf3   :  { %v317_v38 = vmax.f32 %v217_v34, 0.0 }
  0xf4   :  { %v345_v39 = vpack.c.bf16 %v319_v36, %v318_v35 }
  0xf5   :  { %v344_v40 = vpack.c.bf16 %v317_v38, %v316_v37  ;;  %v999_v41 = vpop.f32.mrb[12].mxu0 }
  0xf6   :  { %v238_v42 = vadd.f32 %v999_v41, %v1268_v62  ;;  %v229_v43 = vpop.f32.mrb[13].mxu0 }
  0xf7   :  { %v230_v44 = vadd.f32 %v1268_v62, %v229_v43  ;;  %v1000_v45 = vpop.f32.mrb[14].mxu0  ;;  %1041 = vmatprep.mubr.bf16.mxu1 %v344_v40 }
  0xf8   :  { %v241_v46 = vadd.f32 %v1000_v45, %v1268_v62  ;;  %v232_v47 = vpop.f32.mrb[15].mxu0  ;;  %1042 = vmatmul.mubr.bf16.gmra.mrb[4].mxu1 %v345_v39  ;;  %v322_v49 = vmax.f32 %v238_v42, 0.0 }
  0xf9   :  { %v233_v48 = vadd.f32 %v1268_v62, %v232_v47  ;;  %v320_v51 = vmax.f32 %v230_v44, 0.0 }
  0xfa   :  { %v323_v50 = vmax.f32 %v241_v46, 0.0 }
  0xfb   :  { %v321_v52 = vmax.f32 %v233_v48, 0.0 }
  0xfc   :  { %v347_v53 = vpack.c.bf16 %v323_v50, %v322_v49  ;;  %v1305_v49 = vld [vmem:[%s1391_s4] ss:$0 sm:$0xff] }
  0xfd   :  { %v346_v54 = vpack.c.bf16 %v321_v52, %v320_v51  ;;  %v1003_v55 = vpop.f32.mrb[16].mxu0 }
  0xfe   :  { %v254_v56 = vadd.f32 %v1003_v55, %v1268_v62  ;;  %v245_v57 = vpop.f32.mrb[17].mxu0 }
  0xff   :  { %v246_v58 = vadd.f32 %v1268_v62, %v245_v57  ;;  %v1004_v59 = vpop.f32.mrb[18].mxu0  ;;  %1045 = vmatprep.mubr.bf16.mxu1 %v346_v54 }
 0x100   :  { %v257_v60 = vadd.f32 %v1004_v59, %v1268_v62  ;;  %v248_v61 = vpop.f32.mrb[19].mxu0  ;;  %1046 = vmatmul.mubr.bf16.gmra.mrb[8].mxu1 %v347_v53  ;;  %v326_v0 = vmax.f32 %v254_v56, 0.0 }
 0x101   :  { %v249_v63 = vadd.f32 %v1268_v62, %v248_v61  ;;  %v324_v2 = vmax.f32 %v246_v58, 0.0 }
 0x102   :  { %v327_v1 = vmax.f32 %v257_v60, 0.0 }
 0x103   :  { %v325_v3 = vmax.f32 %v249_v63, 0.0 }
 0x104   :  { %v349_v4 = vpack.c.bf16 %v327_v1, %v326_v0 }
 0x105   :  { %v348_v5 = vpack.c.bf16 %v325_v3, %v324_v2  ;;  %v1007_v6 = vpop.f32.mrb[20].mxu0 }
 0x106   :  { %v270_v7 = vadd.f32 %v1007_v6, %v1268_v62  ;;  %v261_v8 = vpop.f32.mrb[21].mxu0 }
 0x107   :  { %v262_v9 = vadd.f32 %v1268_v62, %v261_v8  ;;  %v1008_v10 = vpop.f32.mrb[22].mxu0  ;;  %1049 = vmatprep.mubr.bf16.mxu1 %v348_v5 }
 0x108   :  { %v273_v11 = vadd.f32 %v1008_v10, %v1268_v62  ;;  %v264_v12 = vpop.f32.mrb[23].mxu0  ;;  %1050 = vmatmul.mubr.bf16.gmra.mrb[12].mxu1 %v349_v4  ;;  %v330_v14 = vmax.f32 %v270_v7, 0.0 }
 0x109   :  { %v265_v13 = vadd.f32 %v1268_v62, %v264_v12  ;;  %v328_v16 = vmax.f32 %v262_v9, 0.0 }
 0x10a   :  { %v331_v15 = vmax.f32 %v273_v11, 0.0 }
 0x10b   :  { %v329_v17 = vmax.f32 %v265_v13, 0.0 }
 0x10c   :  { %v351_v18 = vpack.c.bf16 %v331_v15, %v330_v14 }
 0x10d   :  { %v350_v19 = vpack.c.bf16 %v329_v17, %v328_v16  ;;  %v1011_v20 = vpop.f32.mrb[24].mxu0 }
 0x10e   :  { %v286_v21 = vadd.f32 %v1011_v20, %v1268_v62  ;;  %v277_v22 = vpop.f32.mrb[25].mxu0 }
 0x10f   :  { %v278_v23 = vadd.f32 %v1268_v62, %v277_v22  ;;  %v1012_v24 = vpop.f32.mrb[26].mxu0  ;;  %1053 = vmatprep.mubr.bf16.mxu1 %v350_v19 }
 0x110   :  { %v289_v25 = vadd.f32 %v1012_v24, %v1268_v62  ;;  %v280_v26 = vpop.f32.mrb[27].mxu0  ;;  %1054 = vmatmul.mubr.bf16.gmra.mrb[16].mxu1 %v351_v18  ;;  %v334_v28 = vmax.f32 %v286_v21, 0.0 }
 0x111   :  { %v281_v27 = vadd.f32 %v1268_v62, %v280_v26  ;;  %v332_v30 = vmax.f32 %v278_v23, 0.0 }
 0x112   :  { %v335_v29 = vmax.f32 %v289_v25, 0.0 }
 0x113   :  { %v333_v31 = vmax.f32 %v281_v27, 0.0 }
 0x114   :  { %v353_v32 = vpack.c.bf16 %v335_v29, %v334_v28 }
 0x115   :  { %v352_v33 = vpack.c.bf16 %v333_v31, %v332_v30  ;;  %v1015_v34 = vpop.f32.mrb[28].mxu0 }
 0x116   :  { %v302_v35 = vadd.f32 %v1015_v34, %v1268_v62  ;;  %v293_v36 = vpop.f32.mrb[29].mxu0 }
 0x117   :  { %v294_v37 = vadd.f32 %v1268_v62, %v293_v36  ;;  %v1016_v38 = vpop.f32.mrb[30].mxu0  ;;  %1057 = vmatprep.mubr.bf16.mxu1 %v352_v33 }
 0x118   :  { %v305_v39 = vadd.f32 %v1016_v38, %v1268_v62  ;;  %v296_v40 = vpop.f32.mrb[31].mxu0  ;;  %1058 = vmatmul.mubr.bf16.gmra.mrb[20].mxu1 %v353_v32  ;;  %v338_v42 = vmax.f32 %v302_v35, 0.0 }
 0x119   :  { %v297_v41 = vadd.f32 %v1268_v62, %v296_v40  ;;  %v336_v44 = vmax.f32 %v294_v37, 0.0 }
 0x11a   :  { %v339_v43 = vmax.f32 %v305_v39, 0.0 }
 0x11b   :  { %v337_v45 = vmax.f32 %v297_v41, 0.0 }
 0x11c   :  { %v355_v46 = vpack.c.bf16 %v339_v43, %v338_v42 }
 0x11d   :  { %v354_v47 = vpack.c.bf16 %v337_v45, %v336_v44 }
 0x11f   :  { %1061 = vmatprep.mubr.bf16.mxu1 %v354_v47 }
 0x120   :  { %1062 = vmatmul.mubr.bf16.gmra.mrb[24].mxu1 %v355_v46 }
 0x1bb   :  { %v1035_v48 = vpop.f32.mrb[32].mxu0 }
 0x1bc   :  { %v461_v50 = vpop.f32.mrb[33].mxu0  ;;  %v470_v52 = vadd.f32 %v1035_v48, %v1305_v49 }
 0x1bd   :  { %v1036_v51 = vpop.f32.mrb[34].mxu0  ;;  %v462_v54 = vadd.f32 %v1305_v49, %v461_v50 }
 0x1be   :  { %v473_v62 = vadd.f32 %v1036_v51, %v1305_v49  ;;  %v464_v53 = vpop.f32.mrb[35].mxu0 }
 0x1bf   :  { %v465_v55 = vadd.f32 %v1305_v49, %v464_v53 }
 0x1c0   :  { %v852_v56 = vpack.c.bf16 %v473_v62, %v470_v52 }
 0x1c1   :  { %v847_v57 = vpack.c.bf16 %v465_v55, %v462_v54 }
 0x1c2   :  { %924 = vst [vmem:[%s1392_s5 + $0x8] sm:$0xff] %v852_v56  }
 0x1c3   :  { %848 = vst [vmem:[%s1392_s5] sm:$0xff] %v847_v57   ;;  %v1039_v58 = vpop.f32.mrb[0].mxu1 }
 0x1c4   :  { %v477_v59 = vpop.f32.mrb[1].mxu1  ;;  %v486_v61 = vadd.f32 %v1039_v58, %v1305_v49 }
 0x1c5   :  { %v1040_v60 = vpop.f32.mrb[2].mxu1  ;;  %v478_v1 = vadd.f32 %v1305_v49, %v477_v59 }
 0x1c6   :  { %v489_v63 = vadd.f32 %v1040_v60, %v1305_v49  ;;  %v480_v0 = vpop.f32.mrb[3].mxu1 }
 0x1c7   :  { %v481_v2 = vadd.f32 %v1305_v49, %v480_v0 }
 0x1c8   :  { %v862_v3 = vpack.c.bf16 %v489_v63, %v486_v61 }
 0x1c9   :  { %v857_v4 = vpack.c.bf16 %v481_v2, %v478_v1 }
 0x1ca   :  { %926 = vst [vmem:[%s1392_s5 + $0x18] sm:$0xff] %v862_v3  }
 0x1cb   :  { %925 = vst [vmem:[%s1392_s5 + $0x10] sm:$0xff] %v857_v4   ;;  %v1043_v5 = vpop.f32.mrb[4].mxu1 }
 0x1cc   :  { %v493_v6 = vpop.f32.mrb[5].mxu1  ;;  %v502_v8 = vadd.f32 %v1043_v5, %v1305_v49 }
 0x1cd   :  { %v1044_v7 = vpop.f32.mrb[6].mxu1  ;;  %v494_v11 = vadd.f32 %v1305_v49, %v493_v6 }
 0x1ce   :  { %v505_v9 = vadd.f32 %v1044_v7, %v1305_v49  ;;  %v496_v10 = vpop.f32.mrb[7].mxu1 }
 0x1cf   :  { %v497_v12 = vadd.f32 %v1305_v49, %v496_v10 }
 0x1d0   :  { %v872_v13 = vpack.c.bf16 %v505_v9, %v502_v8 }
 0x1d1   :  { %v867_v14 = vpack.c.bf16 %v497_v12, %v494_v11 }
 0x1d2   :  { %928 = vst [vmem:[%s1392_s5 + $0x28] sm:$0xff] %v872_v13  }
 0x1d3   :  { %927 = vst [vmem:[%s1392_s5 + $0x20] sm:$0xff] %v867_v14   ;;  %v1047_v15 = vpop.f32.mrb[8].mxu1 }
 0x1d4   :  { %v509_v16 = vpop.f32.mrb[9].mxu1  ;;  %v518_v18 = vadd.f32 %v1047_v15, %v1305_v49 }
 0x1d5   :  { %v1048_v17 = vpop.f32.mrb[10].mxu1  ;;  %v510_v21 = vadd.f32 %v1305_v49, %v509_v16 }
 0x1d6   :  { %v521_v19 = vadd.f32 %v1048_v17, %v1305_v49  ;;  %v512_v20 = vpop.f32.mrb[11].mxu1 }
 0x1d7   :  { %v513_v22 = vadd.f32 %v1305_v49, %v512_v20 }
 0x1d8   :  { %v882_v23 = vpack.c.bf16 %v521_v19, %v518_v18 }
 0x1d9   :  { %v877_v24 = vpack.c.bf16 %v513_v22, %v510_v21 }
 0x1da   :  { %930 = vst [vmem:[%s1392_s5 + $0x38] sm:$0xff] %v882_v23  }
 0x1db   :  { %929 = vst [vmem:[%s1392_s5 + $0x30] sm:$0xff] %v877_v24   ;;  %v1051_v25 = vpop.f32.mrb[12].mxu1 }
 0x1dc   :  { %v525_v26 = vpop.f32.mrb[13].mxu1  ;;  %v534_v28 = vadd.f32 %v1051_v25, %v1305_v49 }
 0x1dd   :  { %v1052_v27 = vpop.f32.mrb[14].mxu1  ;;  %v526_v31 = vadd.f32 %v1305_v49, %v525_v26 }
 0x1de   :  { %v537_v29 = vadd.f32 %v1052_v27, %v1305_v49  ;;  %v528_v30 = vpop.f32.mrb[15].mxu1 }
 0x1df   :  { %v529_v32 = vadd.f32 %v1305_v49, %v528_v30 }
 0x1e0   :  { %v892_v33 = vpack.c.bf16 %v537_v29, %v534_v28 }
 0x1e1   :  { %v887_v34 = vpack.c.bf16 %v529_v32, %v526_v31 }
 0x1e2   :  { %932 = vst [vmem:[%s1392_s5 + $0x48] sm:$0xff] %v892_v33  }
 0x1e3   :  { %931 = vst [vmem:[%s1392_s5 + $0x40] sm:$0xff] %v887_v34   ;;  %v1055_v35 = vpop.f32.mrb[16].mxu1 }
 0x1e4   :  { %v541_v36 = vpop.f32.mrb[17].mxu1  ;;  %v550_v38 = vadd.f32 %v1055_v35, %v1305_v49 }
 0x1e5   :  { %v1056_v37 = vpop.f32.mrb[18].mxu1  ;;  %v542_v41 = vadd.f32 %v1305_v49, %v541_v36 }
 0x1e6   :  { %v553_v39 = vadd.f32 %v1056_v37, %v1305_v49  ;;  %v544_v40 = vpop.f32.mrb[19].mxu1 }
 0x1e7   :  { %v545_v42 = vadd.f32 %v1305_v49, %v544_v40 }
 0x1e8   :  { %v902_v43 = vpack.c.bf16 %v553_v39, %v550_v38 }
 0x1e9   :  { %v897_v44 = vpack.c.bf16 %v545_v42, %v542_v41 }
 0x1ea   :  { %934 = vst [vmem:[%s1392_s5 + $0x58] sm:$0xff] %v902_v43  }
 0x1eb   :  { %933 = vst [vmem:[%s1392_s5 + $0x50] sm:$0xff] %v897_v44   ;;  %v1059_v45 = vpop.f32.mrb[20].mxu1 }
 0x1ec   :  { %v557_v46 = vpop.f32.mrb[21].mxu1  ;;  %v566_v48 = vadd.f32 %v1059_v45, %v1305_v49 }
 0x1ed   :  { %v1060_v47 = vpop.f32.mrb[22].mxu1  ;;  %v558_v52 = vadd.f32 %v1305_v49, %v557_v46 }
 0x1ee   :  { %v569_v50 = vadd.f32 %v1060_v47, %v1305_v49  ;;  %v560_v51 = vpop.f32.mrb[23].mxu1 }
 0x1ef   :  { %v561_v62 = vadd.f32 %v1305_v49, %v560_v51 }
 0x1f0   :  { %v912_v53 = vpack.c.bf16 %v569_v50, %v566_v48 }
 0x1f1   :  { %v907_v54 = vpack.c.bf16 %v561_v62, %v558_v52 }
 0x1f2   :  { %936 = vst [vmem:[%s1392_s5 + $0x68] sm:$0xff] %v912_v53  }
 0x1f3   :  { %935 = vst [vmem:[%s1392_s5 + $0x60] sm:$0xff] %v907_v54   ;;  %v1063_v55 = vpop.f32.mrb[24].mxu1 }
 0x1f4   :  { %v573_v56 = vpop.f32.mrb[25].mxu1  ;;  %v582_v58 = vadd.f32 %v1063_v55, %v1305_v49 }
 0x1f5   :  { %v1064_v57 = vpop.f32.mrb[26].mxu1  ;;  %v574_v61 = vadd.f32 %v1305_v49, %v573_v56 }
 0x1f6   :  { %v585_v59 = vadd.f32 %v1064_v57, %v1305_v49  ;;  %v576_v60 = vpop.f32.mrb[27].mxu1 }
 0x1f7   :  { %v577_v63 = vadd.f32 %v1305_v49, %v576_v60 }
 0x1f8   :  { %v922_v0 = vpack.c.bf16 %v585_v59, %v582_v58 }
 0x1f9   :  { %v917_v1 = vpack.c.bf16 %v577_v63, %v574_v61 }
 0x1fa   :  { %938 = vst [vmem:[%s1392_s5 + $0x78] sm:$0xff] %v922_v0  }
 0x1fb   :  { %937 = vst [vmem:[%s1392_s5 + $0x70] sm:$0xff] %v917_v1  }

</bundles_post_ra>
